<compile_context>
chip_gen: v6e
topology: v6e:2x2x1
jax: 0.10.0
libtpu: 0.0.40
codegen_flags: <defaults>
</compile_context>

<pallas_src>
import functools

import jax
import jax.numpy as jnp
import numpy as np
from jax.experimental import pallas as pl
from jax.experimental.pallas import tpu as pltpu

LANE = 128


def _round_up(x, m):
    return ((x + m - 1) // m) * m


def _pick_tile(total, pref):
    """Largest multiple of 128 that divides `total` and is <= pref."""
    t = min(pref, total)
    t = (t // LANE) * LANE
    while t > LANE and total % t != 0:
        t -= LANE
    return max(t, LANE)


# --------------------------- kernels ---------------------------------------


def _gcn1_kernel(adj_ref, xw_ref, w12_ref, o_ref, acc_ref):
    # Accumulate adj_tile @ XW0_ktile in f32; on the last K step apply relu and
    # immediately project with the fused [W1|W2] so `hidden` never hits HBM.
    k = pl.program_id(1)

    @pl.when(k == 0)
    def _():
        acc_ref[...] = jnp.zeros_like(acc_ref)

    acc_ref[...] += jnp.dot(adj_ref[...], xw_ref[...],
                            preferred_element_type=jnp.float32)

    @pl.when(k == pl.num_programs(1) - 1)
    def _():
        hidden = jnp.maximum(acc_ref[...], 0.0)
        o_ref[...] = jnp.dot(hidden, w12_ref[...],
                             preferred_element_type=jnp.float32)


def _gcn2_kernel(adj_ref, hw_ref, noise_ref, z_ref, acc_ref, *, h2):
    # Accumulate [mean | logstd] tile = adj_tile @ HW12_ktile; reparameterize
    # in-register on the last K step.
    k = pl.program_id(1)

    @pl.when(k == 0)
    def _():
        acc_ref[...] = jnp.zeros_like(acc_ref)

    acc_ref[...] += jnp.dot(adj_ref[...], hw_ref[...],
                            preferred_element_type=jnp.float32)

    @pl.when(k == pl.num_programs(1) - 1)
    def _():
        m_ls = acc_ref[...]
        mean = m_ls[:, :h2]
        logstd = m_ls[:, h2:]
        z_ref[...] = noise_ref[...] * jnp.exp(logstd) + mean


def _decode_kernel(zi_ref, zjt_ref, a_ref):
    # logits tile = Z_rows @ Z^T_cols : standard (M,K)x(K,N) lane-dense matmul.
    logits = jnp.dot(zi_ref[...], zjt_ref[...],
                     preferred_element_type=jnp.float32)
    # sigmoid(x) == 0.5 * tanh(0.5 * x) + 0.5  -> single EUP op per element.
    a_ref[...] = (0.5 * jnp.tanh(0.5 * logits) + 0.5).astype(a_ref.dtype)


# --------------------------- wrapper ----------------------------------------


def vgae_forward(x, adj, w0, w1, w2, noise, *,
                 compute_dtype=jnp.bfloat16, out_dtype=jnp.bfloat16):
    n, _ = x.shape
    h1 = w0.shape[1]
    h2 = w1.shape[1]

    # Pad N up to a multiple of 128 so all tiles are lane-dense.  Zero padding
    # is exact for the valid region (zero rows/cols contribute nothing).
    n_p = max(_round_up(n, LANE), LANE)
    if n_p != n:
        x = jnp.pad(x, ((0, n_p - n), (0, 0)))
        adj = jnp.pad(adj, ((0, n_p - n), (0, n_p - n)))
        noise = jnp.pad(noise, ((0, n_p - n), (0, 0)))

    # adj is read twice (stages 2 and 3) and both passes are HBM-bound on it:
    # stream it in the (narrower) compute dtype; accumulation stays f32.
    adj_c = adj.astype(compute_dtype)
    noise = noise.astype(jnp.float32)

    # Fuse the mean / logstd weights -> one adj pass for both heads.
    w12 = jnp.concatenate([w1, w2], axis=1).astype(jnp.float32)  # [h1, 2*h2]

    # ---- stage 1: XW0 = X @ W0 (tiny; plain XLA dot, no pallas_call) -------
    xw0 = jnp.dot(x, w0).astype(compute_dtype)                   # [n_p, h1]

    tm_e = _pick_tile(n_p, 256)        # encoder row tile
    tk_e = _pick_tile(n_p, 2048)       # encoder adj-column (reduction) tile
    enc_grid = (n_p // tm_e, n_p // tk_e)
    enc_sem = pltpu.CompilerParams(
        dimension_semantics=("parallel", "arbitrary"))

    # ---- stage 2: HW12 = relu(adj @ XW0) @ [W1|W2]  (stream adj, K-tiled) --
    hw12 = pl.pallas_call(
        _gcn1_kernel,
        out_shape=jax.ShapeDtypeStruct((n_p, 2 * h2), jnp.float32),
        grid=enc_grid,
        in_specs=[pl.BlockSpec((tm_e, tk_e), lambda i, k: (i, k)),
                  pl.BlockSpec((tk_e, h1), lambda i, k: (k, 0)),
                  pl.BlockSpec((h1, 2 * h2), lambda i, k: (0, 0))],
        out_specs=pl.BlockSpec((tm_e, 2 * h2), lambda i, k: (i, 0)),
        scratch_shapes=[pltpu.VMEM((tm_e, h1), jnp.float32)],
        compiler_params=enc_sem,
    )(adj_c, xw0, w12)

    # ---- stage 3: Z = noise * exp(logstd) + mean  (stream adj, K-tiled) ----
    hw12_c = hw12.astype(compute_dtype)
    z = pl.pallas_call(
        functools.partial(_gcn2_kernel, h2=h2),
        out_shape=jax.ShapeDtypeStruct((n_p, h2), jnp.float32),
        grid=enc_grid,
        in_specs=[pl.BlockSpec((tm_e, tk_e), lambda i, k: (i, k)),
                  pl.BlockSpec((tk_e, 2 * h2), lambda i, k: (k, 0)),
                  pl.BlockSpec((tm_e, h2), lambda i, k: (i, 0))],
        out_specs=pl.BlockSpec((tm_e, h2), lambda i, k: (i, 0)),
        scratch_shapes=[pltpu.VMEM((tm_e, 2 * h2), jnp.float32)],
        compiler_params=enc_sem,
    )(adj_c, hw12_c, noise)

    # ---- stage 4: A_pred = sigmoid(Z @ Z.T)  (2-D tiled, lane-dense) -------
    # Z^T is tiny (h2 x N); build it once so the decoder RHS is a standard
    # lane-dense (K, N) operand reused across each grid row.
    zt = z.T                                                     # [h2, n_p]
    tm_d = _pick_tile(n_p, 256)
    tn_d = _pick_tile(n_p, 1024)
    a_pred = pl.pallas_call(
        _decode_kernel,
        out_shape=jax.ShapeDtypeStruct((n_p, n_p), out_dtype),
        grid=(n_p // tm_d, n_p // tn_d),
        in_specs=[pl.BlockSpec((tm_d, h2), lambda i, j: (i, 0)),
                  pl.BlockSpec((h2, tn_d), lambda i, j: (0, j))],
        out_specs=pl.BlockSpec((tm_d, tn_d), lambda i, j: (i, j)),
        compiler_params=pltpu.CompilerParams(
            dimension_semantics=("parallel", "parallel")),
    )(z, zt)

    return a_pred[:n, :n]


# --------------------------- reference & demo --------------------------------


def glorot_init(key, input_dim, output_dim):
    # Matches torch glorot_init: uniform in [-r, r], r = sqrt(6/(in+out))
    r = np.sqrt(6.0 / (input_dim + output_dim))
    return jax.random.uniform(
        key, (input_dim, output_dim), dtype=jnp.float32, minval=-r, maxval=r)


def reference_forward(x, adj, w0, w1, w2, noise):
    hidden = jax.nn.relu(adj @ (x @ w0))
    mean = adj @ (hidden @ w1)
    logstd = adj @ (hidden @ w2)
    z = noise * jnp.exp(logstd) + mean
    return jax.nn.sigmoid(z @ z.T)


if __name__ == "__main__":
    # Small shapes consistent with the module: N nodes, input_dim features,
    # hidden1_dim=32, hidden2_dim=16.
    N = 64
    input_dim = 32
    hidden1_dim = 32
    hidden2_dim = 16

    key = jax.random.PRNGKey(0)
    k_x, k_adj, k_w0, k_w1, k_w2, k_noise = jax.random.split(key, 6)

    # Dense node features (the torch version builds a sparse feature matrix;
    # semantically identical to a dense matmul).
    x = jax.random.uniform(k_x, (N, input_dim), dtype=jnp.float32)

    # Symmetric normalized adjacency with self-loops (dense).
    a_raw = (jax.random.uniform(k_adj, (N, N)) < 0.1).astype(jnp.float32)
    a_sym = jnp.maximum(a_raw, a_raw.T) + jnp.eye(N, dtype=jnp.float32)
    deg = jnp.sum(a_sym, axis=1)
    d_inv_sqrt = 1.0 / jnp.sqrt(deg)
    adj = a_sym * d_inv_sqrt[:, None] * d_inv_sqrt[None, :]

    # Deterministic glorot-initialized weights (shapes from __init__).
    w0 = glorot_init(k_w0, input_dim, hidden1_dim)
    w1 = glorot_init(k_w1, hidden1_dim, hidden2_dim)
    w2 = glorot_init(k_w2, hidden1_dim, hidden2_dim)

    # torch.randn(X.size(0), hidden2_dim) -> deterministic gaussian noise here.
    noise = jax.random.normal(k_noise, (N, hidden2_dim), dtype=jnp.float32)

    a_ref = reference_forward(x, adj, w0, w1, w2, noise)

    # Production path: bf16 adj stream + bf16 A_pred writeback (loose check).
    a_pred = vgae_forward(x, adj, w0, w1, w2, noise)
    jax.block_until_ready(a_pred)
    assert a_pred.shape == (N, N)
    np.testing.assert_allclose(np.asarray(a_pred, dtype=np.float32),
                               np.asarray(a_ref), rtol=3e-2, atol=3e-2)

    # Full-precision path for a tight numerical check.
    a_pred_f32 = vgae_forward(x, adj, w0, w1, w2, noise,
                              compute_dtype=jnp.float32,
                              out_dtype=jnp.float32)
    jax.block_until_ready(a_pred_f32)
    np.testing.assert_allclose(np.asarray(a_pred_f32), np.asarray(a_ref),
                               rtol=1e-4, atol=1e-5)

    print("KERNEL_OK")
</pallas_src>

<mosaic_0001>
module attributes {stable_mosaic.version = 11 : i64} {
  func.func @_gcn1_kernel(%arg0: i32, %arg1: i32, %arg2: memref<128x128xbf16, #tpu.memory_space<vmem>>, %arg3: memref<128x32xbf16, #tpu.memory_space<vmem>>, %arg4: memref<32x32xf32, #tpu.memory_space<vmem>>, %arg5: memref<128x32xf32, #tpu.memory_space<vmem>>, %arg6: memref<128x32xf32, #tpu.memory_space<vmem>>) attributes {dimension_semantics = [#tpu.dimension_semantics<parallel>, #tpu.dimension_semantics<arbitrary>], iteration_bounds = array<i64: 1, 1>, scalar_prefetch = 0 : i64, scratch_operands = 1 : i64, tpu.core_type = #tpu.core_type<tc>, window_params = [{transform_indices = @transform_0, window_bounds = array<i64: 128, 128>}, {transform_indices = @transform_1, window_bounds = array<i64: 128, 32>}, {pipeline_mode = #tpu.pipeline_mode<synchronous>, transform_indices = @transform_2, window_bounds = array<i64: 32, 32>}, {transform_indices = @transform_3, window_bounds = array<i64: 128, 32>}]} {
    %c0_i32 = arith.constant 0 : i32
    %0 = arith.cmpi eq, %arg1, %c0_i32 : i32
    %1 = arith.extui %0 : i1 to i32
    %c0_i32_0 = arith.constant 0 : i32
    %2 = arith.cmpi ne, %1, %c0_i32_0 : i32
    scf.if %2 {
      %cst_10 = arith.constant 0.000000e+00 : f32
      %12 = vector.broadcast %cst_10 : f32 to vector<128x32xf32>
      %c0_11 = arith.constant 0 : index
      %c0_12 = arith.constant 0 : index
      %13 = vector.load %arg6[%c0_11, %c0_12] : memref<128x32xf32, #tpu.memory_space<vmem>>, vector<128x32xf32>
      tpu.vector_store %arg6[%c0_11, %c0_12], %12 {strides = array<i32>} : memref<128x32xf32, #tpu.memory_space<vmem>>, vector<128x32xf32>,
    } else {
    }
    %c0 = arith.constant 0 : index
    %c0_1 = arith.constant 0 : index
    %3 = vector.load %arg6[%c0, %c0_1] : memref<128x32xf32, #tpu.memory_space<vmem>>, vector<128x32xf32>
    %c0_2 = arith.constant 0 : index
    %c0_3 = arith.constant 0 : index
    %4 = vector.load %arg2[%c0_2, %c0_3] : memref<128x128xbf16, #tpu.memory_space<vmem>>, vector<128x128xbf16>
    %c0_4 = arith.constant 0 : index
    %c0_5 = arith.constant 0 : index
    %5 = vector.load %arg3[%c0_4, %c0_5] : memref<128x32xbf16, #tpu.memory_space<vmem>>, vector<128x32xbf16>
    %cst = arith.constant dense<0.000000e+00> : vector<128x32xf32>
    %6 = tpu.matmul %4, %5, %cst {dimension_numbers = #tpu.dot_dimension_numbers<[1], [0], [0], [1], [0, 0, 1, 1], [], []>} : vector<128x128xbf16>, vector<128x32xbf16>, vector<128x32xf32> -> vector<128x32xf32>
    %7 = arith.addf %3, %6 : vector<128x32xf32>
    %c0_6 = arith.constant 0 : index
    %c0_7 = arith.constant 0 : index
    %8 = vector.load %arg6[%c0_6, %c0_7] : memref<128x32xf32, #tpu.memory_space<vmem>>, vector<128x32xf32>
    tpu.vector_store %arg6[%c0_6, %c0_7], %7 {strides = array<i32>} : memref<128x32xf32, #tpu.memory_space<vmem>>, vector<128x32xf32>,
    %c0_i32_8 = arith.constant 0 : i32
    %9 = arith.cmpi eq, %arg1, %c0_i32_8 : i32
    %10 = arith.extui %9 : i1 to i32
    %c0_i32_9 = arith.constant 0 : i32
    %11 = arith.cmpi ne, %10, %c0_i32_9 : i32
    scf.if %11 {
      %c0_10 = arith.constant 0 : index
      %c0_11 = arith.constant 0 : index
      %12 = vector.load %arg6[%c0_10, %c0_11] : memref<128x32xf32, #tpu.memory_space<vmem>>, vector<128x32xf32>
      %cst_12 = arith.constant 0.000000e+00 : f32
      %13 = vector.broadcast %cst_12 : f32 to vector<128x32xf32>
      %14 = arith.maximumf %12, %13 : vector<128x32xf32>
      %c0_13 = arith.constant 0 : index
      %c0_14 = arith.constant 0 : index
      %15 = vector.load %arg4[%c0_13, %c0_14] : memref<32x32xf32, #tpu.memory_space<vmem>>, vector<32x32xf32>
      %cst_15 = arith.constant dense<0.000000e+00> : vector<128x32xf32>
      %16 = tpu.matmul %14, %15, %cst_15 {dimension_numbers = #tpu.dot_dimension_numbers<[1], [0], [0], [1], [0, 0, 1, 1], [], []>} : vector<128x32xf32>, vector<32x32xf32>, vector<128x32xf32> -> vector<128x32xf32>
      %c0_16 = arith.constant 0 : index
      %c0_17 = arith.constant 0 : index
      %17 = vector.load %arg5[%c0_16, %c0_17] : memref<128x32xf32, #tpu.memory_space<vmem>>, vector<128x32xf32>
      tpu.vector_store %arg5[%c0_16, %c0_17], %16 {strides = array<i32>} : memref<128x32xf32, #tpu.memory_space<vmem>>, vector<128x32xf32>,
    } else {
    }
    return
  }
  func.func @transform_0(%arg0: i32, %arg1: i32) -> (i32, i32) {
    %c0_i32 = arith.constant 0 : i32
    return %arg0, %arg1 : i32, i32
  }
  func.func @transform_1(%arg0: i32, %arg1: i32) -> (i32, i32) {
    %c0_i32 = arith.constant 0 : i32
    %c0_i32_0 = arith.constant 0 : i32
    return %arg1, %c0_i32 : i32, i32
  }
  func.func @transform_2(%arg0: i32, %arg1: i32) -> (i32, i32) {
    %c0_i32 = arith.constant 0 : i32
    %c0_i32_0 = arith.constant 0 : i32
    %c0_i32_1 = arith.constant 0 : i32
    return %c0_i32, %c0_i32_0 : i32, i32
  }
  func.func @transform_3(%arg0: i32, %arg1: i32) -> (i32, i32) {
    %c0_i32 = arith.constant 0 : i32
    %c0_i32_0 = arith.constant 0 : i32
    return %arg0, %c0_i32 : i32, i32
  }
}

</mosaic_0001>

<bundles_post_ra>
// kernel: tpu_custom_call.1
= control target key start
LH: loop header
LB: loop body
LE: loop exit
PB: predicated region body
PF: predicated region fallthrough
CT: control target
= control target key end

     0   :  { %8 = vsyncpa [#allocation4], 0  ;;  %s751_s12 = smov [#allocation3]   ;;  %s938_s0 = inlined_call_operand.vmem [shape: bf16[128,128], index: 0, kind: input, shape index: {}]   ;;  %s939_s1 = inlined_call_operand.vmem [shape: bf16[128,32], index: 1, kind: input, shape index: {}]   ;;  %s940_s2 = inlined_call_operand.hbm [shape: f32[32,32], index: 2, kind: input, shape index: {}]   ;;  %s941_s3 = inlined_call_operand.vmem [shape: f32[128,32], index: 3, kind: output, shape index: {}]  }
   0x1   :  { %s18_s13 = sshll.u32 %s751_s12, 4  ;;  %s19_s13 = int_to_ptr.vmem [resolvable:$true] %s18_s13 }
   0x2   :  { %s737_s14 = scalar_lea.vmem %s19_s13, 512  ;;  %p742_p1 = scmp.lt.s32.totalorder %s19_s13, %s19_s13 }
   0x3   :  { %p738_p0 = scmp.ne.s32.totalorder %s19_s13, %s737_s14  ;;  %p743_p2 = scmp.lt.s32.totalorder %s737_s14, %s737_s14 }
   0x5   :  { %p744_p3 = por %p743_p2, %p742_p1 }
   0x7   :  { %p745_p4 = pnand %p744_p3, %p738_p0 }
   0x9   :  { %748 = shalt.err (!%p745_p4)
}
   0xa   :  { %s752_s15 = smov 128   ;;  %s753_s16 = smov 8  }
   0xb   :  { %24 = dma.hbm_to_vmem [thread:$0]  %s940_s2, 512, %s19_s13, [#allocation4], %s752_s15, %s752_s15, %s753_s16  }
   0xc   :  { %749 = dma.done.wait [#allocation4], 512  }
   0xd   :  { %750 = vsyncadd [#allocation4], 4294966784  ;;  %vm33_vm0 = vcmask 261120   ;;  %v754_v0 = vmov 0.0   ;;  %v713_v1 = vld [vmem:[%s939_s1 + $0x38] sm:$0xff]   ;;  %v714_v2 = vld [vmem:[%s939_s1 + $0x30] sm:$0xff]  }
   0xe   :  { %36 = vst.msk [vmem:[#allocation2 + $0x10] sm:$0xff] %vm33_vm0, %v754_v0  ;;  %34 = vst.msk [vmem:[#allocation2] sm:$0xff] %vm33_vm0, %v754_v0  ;;  %645 = vmatprep.subr.bf16.mxu0 %v713_v1  ;;  %v715_v3 = vld [vmem:[%s939_s1 + $0x28] sm:$0xff]   ;;  %v716_v4 = vld [vmem:[%s939_s1 + $0x20] sm:$0xff]  }
   0xf   :  { %35 = vst.msk [vmem:[#allocation2 + $0x8] sm:$0xff] %vm33_vm0, %v754_v0  ;;  %37 = vst.msk [vmem:[#allocation2 + $0x18] sm:$0xff] %vm33_vm0, %v754_v0  ;;  %646 = vmatpush3.bf16.msra.mxu0 %v713_v1  ;;  %v721_v5 = vld [vmem:[%s938_s0] sm:$0xff]   ;;  %v717_v6 = vld [vmem:[%s939_s1 + $0x18] sm:$0xff]  }
  0x10   :  { %38 = vst.msk [vmem:[#allocation2 + $0x20] sm:$0xff] %vm33_vm0, %v754_v0  ;;  %39 = vst.msk [vmem:[#allocation2 + $0x28] sm:$0xff] %vm33_vm0, %v754_v0  ;;  %647 = vmatprep.subr.bf16.mxu0 %v714_v2  ;;  %661 = vmatprep.mubr.bf16.mxu0 %v721_v5  ;;  %v718_v7 = vld [vmem:[%s939_s1 + $0x10] sm:$0xff]   ;;  %v719_v8 = vld [vmem:[%s939_s1 + $0x8] sm:$0xff]  }
  0x11   :  { %40 = vst.msk [vmem:[#allocation2 + $0x30] sm:$0xff] %vm33_vm0, %v754_v0  ;;  %41 = vst.msk [vmem:[#allocation2 + $0x38] sm:$0xff] %vm33_vm0, %v754_v0  ;;  %v720_v9 = vld [vmem:[%s939_s1] sm:$0xff]   ;;  %v722_v10 = vld [vmem:[%s938_s0 + $0x8] sm:$0xff]  }
  0x12   :  { %42 = vst.msk [vmem:[#allocation2 + $0x40] sm:$0xff] %vm33_vm0, %v754_v0  ;;  %43 = vst.msk [vmem:[#allocation2 + $0x48] sm:$0xff] %vm33_vm0, %v754_v0  ;;  %v723_v11 = vld [vmem:[%s938_s0 + $0x10] sm:$0xff]   ;;  %v724_v12 = vld [vmem:[%s938_s0 + $0x18] sm:$0xff]  }
  0x13   :  { %44 = vst.msk [vmem:[#allocation2 + $0x50] sm:$0xff] %vm33_vm0, %v754_v0  ;;  %45 = vst.msk [vmem:[#allocation2 + $0x58] sm:$0xff] %vm33_vm0, %v754_v0  ;;  %648 = vmatpush3.bf16.msra.mxu0 %v714_v2  ;;  %v725_v13 = vld [vmem:[%s938_s0 + $0x20] sm:$0xff]   ;;  %v726_v14 = vld [vmem:[%s938_s0 + $0x28] sm:$0xff]  }
  0x14   :  { %46 = vst.msk [vmem:[#allocation2 + $0x60] sm:$0xff] %vm33_vm0, %v754_v0  ;;  %47 = vst.msk [vmem:[#allocation2 + $0x68] sm:$0xff] %vm33_vm0, %v754_v0  ;;  %649 = vmatprep.subr.bf16.mxu0 %v715_v3  ;;  %v727_v15 = vld [vmem:[%s938_s0 + $0x30] sm:$0xff]   ;;  %v728_v16 = vld [vmem:[%s938_s0 + $0x38] sm:$0xff]  }
  0x15   :  { %48 = vst.msk [vmem:[#allocation2 + $0x70] sm:$0xff] %vm33_vm0, %v754_v0  ;;  %49 = vst.msk [vmem:[#allocation2 + $0x78] sm:$0xff] %vm33_vm0, %v754_v0  ;;  %v362_v17 = vld [vmem:[#allocation3 + $0x18] sm:$0xff]  ;;  %v361_v18 = vld [vmem:[#allocation3 + $0x10] sm:$0xff] }
  0x16   :  { %677 = vmatprep.subr.mxu1 %v362_v17  ;;  %v360_v19 = vld [vmem:[#allocation3 + $0x8] sm:$0xff]  ;;  %v359_v20 = vld [vmem:[#allocation3] sm:$0xff]  ;;  %v52_v21 = vld [vmem:[#allocation2 + $0x10] sm:$0xff] }
  0x17   :  { %650 = vmatpush3.bf16.msra.mxu0 %v715_v3  ;;  %678 = vmatpush3.msra.mxu1 %v362_v17  ;;  %v50_v23 = vld [vmem:[#allocation2] sm:$0xff]  ;;  %v53_v26 = vld [vmem:[#allocation2 + $0x18] sm:$0xff]  ;;  %v51_v29 = vld [vmem:[#allocation2 + $0x8] sm:$0xff] }
  0x18   :  { %651 = vmatprep.subr.bf16.mxu0 %v716_v4  ;;  %679 = vmatprep.subr.mxu1 %v361_v18  ;;  %v56_v32 = vld [vmem:[#allocation2 + $0x30] sm:$0xff]  ;;  %v54_v35 = vld [vmem:[#allocation2 + $0x20] sm:$0xff]  ;;  %v57_v38 = vld [vmem:[#allocation2 + $0x38] sm:$0xff] }
  0x19   :  { %680 = vmatpush3.msra.mxu1 %v361_v18  ;;  %v55_v41 = vld [vmem:[#allocation2 + $0x28] sm:$0xff]  ;;  %v58_v50 = vld [vmem:[#allocation2 + $0x40] sm:$0xff] }
  0x1a   :  { %681 = vmatprep.subr.mxu1 %v360_v19  ;;  %v60_v46 = vld [vmem:[#allocation2 + $0x50] sm:$0xff]  ;;  %v61_v55 = vld [vmem:[#allocation2 + $0x58] sm:$0xff]  ;;  %v59_v60 = vld [vmem:[#allocation2 + $0x48] sm:$0xff] }
  0x1b   :  { %652 = vmatpush3.bf16.msra.mxu0 %v716_v4  ;;  %682 = vmatpush3.msra.mxu1 %v360_v19 }
  0x1c   :  { %653 = vmatprep.subr.bf16.mxu0 %v717_v6  ;;  %683 = vmatprep.subr.mxu1 %v359_v20  ;;  %v64_v2 = vld [vmem:[#allocation2 + $0x70] sm:$0xff] }
  0x1d   :  { %684 = vmatpush3.msra.mxu1 %v359_v20 }
  0x1f   :  { %654 = vmatpush3.bf16.msra.mxu0 %v717_v6  ;;  %v62_v6 = vld [vmem:[#allocation2 + $0x60] sm:$0xff] }
  0x20   :  { %655 = vmatprep.subr.bf16.mxu0 %v718_v7 }
  0x23   :  { %656 = vmatpush3.bf16.msra.mxu0 %v718_v7 }
  0x24   :  { %657 = vmatprep.subr.bf16.mxu0 %v719_v8 }
  0x27   :  { %658 = vmatpush3.bf16.msra.mxu0 %v719_v8 }
  0x28   :  { %659 = vmatprep.subr.bf16.mxu0 %v720_v9 }
  0x2b   :  { %660 = vmatpush3.bf16.msra.mxu0 %v720_v9 }
  0x2e   :  { %662 = vmatmul.mubr.bf16.vlgmr.msra.gmra.mxu0 %v722_v10 }
  0x2f   :  { %665 = vmatprep.mubr.bf16.mxu0 %v723_v11  ;;  %v65_v11 = vld [vmem:[#allocation2 + $0x78] sm:$0xff] }
  0x36   :  { %666 = vmatmul.mubr.bf16.gmra.mxu0 %v724_v12 }
  0x37   :  { %669 = vmatprep.mubr.bf16.mxu0 %v725_v13 }
  0x3e   :  { %670 = vmatmul.mubr.bf16.gmra.mxu0 %v726_v14 }
  0x3f   :  { %673 = vmatprep.mubr.bf16.mxu0 %v727_v15 }
  0x46   :  { %674 = vmatmul.mubr.bf16.gmra.mxu0 %v728_v16  ;;  %v63_v16 = vld [vmem:[#allocation2 + $0x68] sm:$0xff] }
  0xee   :  { %v663_v22 = vpop.f32.mrf.mxu0 }
  0xef   :  { %v293_v24 = vadd.f32 %v663_v22, %v52_v21 }
  0xf0   :  { %v228_v25 = vpop.f32.mrf.mxu0 }
  0xf1   :  { %310 = vst.msk [vmem:[#allocation2 + $0x10] sm:$0xff] %vm33_vm0, %v293_v24  ;;  %v291_v27 = vadd.f32 %v228_v25, %v50_v23 }
  0xf2   :  { %v664_v28 = vpop.f32.mrf.mxu0 }
  0xf3   :  { %308 = vst.msk [vmem:[#allocation2] sm:$0xff] %vm33_vm0, %v291_v27  ;;  %v294_v30 = vadd.f32 %v664_v28, %v53_v26 }
  0xf4   :  { %v231_v31 = vpop.f32.mrf.mxu0 }
  0xf5   :  { %311 = vst.msk [vmem:[#allocation2 + $0x18] sm:$0xff] %vm33_vm0, %v294_v30  ;;  %v292_v33 = vadd.f32 %v231_v31, %v51_v29 }
  0xf6   :  { %v667_v34 = vpop.f32.mrf.mxu0 }
  0xf7   :  { %309 = vst.msk [vmem:[#allocation2 + $0x8] sm:$0xff] %vm33_vm0, %v292_v33  ;;  %v297_v36 = vadd.f32 %v667_v34, %v56_v32 }
  0xf8   :  { %v244_v37 = vpop.f32.mrf.mxu0  ;;  %v329_v48 = vld [vmem:[#allocation2 + $0x10] sm:$0xff] }
  0xf9   :  { %314 = vst.msk [vmem:[#allocation2 + $0x30] sm:$0xff] %vm33_vm0, %v297_v36  ;;  %v295_v39 = vadd.f32 %v244_v37, %v54_v35  ;;  %v345_v56 = vmax.f32 %v329_v48, 0.0 }
  0xfa   :  { %v668_v40 = vpop.f32.mrf.mxu0  ;;  %v327_v42 = vld [vmem:[#allocation2] sm:$0xff] }
  0xfb   :  { %312 = vst.msk [vmem:[#allocation2 + $0x20] sm:$0xff] %vm33_vm0, %v295_v39  ;;  %v298_v43 = vadd.f32 %v668_v40, %v57_v38  ;;  %v343_v44 = vmax.f32 %v327_v42, 0.0 }
  0xfc   :  { %v247_v45 = vpop.f32.mrf.mxu0  ;;  %v330_v57 = vld [vmem:[#allocation2 + $0x18] sm:$0xff] }
  0xfd   :  { %315 = vst.msk [vmem:[#allocation2 + $0x38] sm:$0xff] %vm33_vm0, %v298_v43  ;;  %v296_v47 = vadd.f32 %v247_v45, %v55_v41  ;;  %685 = vmatprep.mubr.msk.f32.mxu1 %vm33_vm0, %v343_v44  ;;  %v346_v63 = vmax.f32 %v330_v57, 0.0 }
  0xfe   :  { %v671_v49 = vpop.f32.mrf.mxu0  ;;  %v328_v51 = vld [vmem:[#allocation2 + $0x8] sm:$0xff] }
  0xff   :  { %313 = vst.msk [vmem:[#allocation2 + $0x28] sm:$0xff] %vm33_vm0, %v296_v47  ;;  %v301_v52 = vadd.f32 %v671_v49, %v60_v46  ;;  %v344_v53 = vmax.f32 %v328_v51, 0.0 }
 0x100   :  { %v260_v54 = vpop.f32.mrf.mxu0  ;;  %v333_v4 = vld [vmem:[#allocation2 + $0x30] sm:$0xff] }
 0x101   :  { %318 = vst.msk [vmem:[#allocation2 + $0x50] sm:$0xff] %vm33_vm0, %v301_v52  ;;  %v299_v58 = vadd.f32 %v260_v54, %v58_v50  ;;  %686 = vmatmul.mubr.msk.f32.vlgmr.msra.gmra.mxu1 %vm33_vm0, %v344_v53  ;;  %v349_v12 = vmax.f32 %v333_v4, 0.0 }
 0x102   :  { %v672_v59 = vpop.f32.mrf.mxu0  ;;  %688 = vmatprep.mubr.msk.f32.mxu1 %vm33_vm0, %v345_v56  ;;  %v331_v61 = vld [vmem:[#allocation2 + $0x20] sm:$0xff] }
 0x103   :  { %316 = vst.msk [vmem:[#allocation2 + $0x40] sm:$0xff] %vm33_vm0, %v299_v58  ;;  %v302_v62 = vadd.f32 %v672_v59, %v61_v55  ;;  %v347_v0 = vmax.f32 %v331_v61, 0.0 }
 0x104   :  { %v263_v1 = vpop.f32.mrf.mxu0  ;;  %v334_v13 = vld [vmem:[#allocation2 + $0x38] sm:$0xff] }
 0x105   :  { %319 = vst.msk [vmem:[#allocation2 + $0x58] sm:$0xff] %vm33_vm0, %v302_v62  ;;  %v300_v3 = vadd.f32 %v263_v1, %v59_v60  ;;  %689 = vmatmul.mubr.msk.f32.gmra.mxu1 %vm33_vm0, %v346_v63  ;;  %v350_v19 = vmax.f32 %v334_v13, 0.0 }
 0x106   :  { %v675_v5 = vpop.f32.mrf.mxu0  ;;  %691 = vmatprep.mubr.msk.f32.mxu1 %vm33_vm0, %v347_v0  ;;  %v332_v7 = vld [vmem:[#allocation2 + $0x28] sm:$0xff] }
 0x107   :  { %317 = vst.msk [vmem:[#allocation2 + $0x48] sm:$0xff] %vm33_vm0, %v300_v3  ;;  %v305_v8 = vadd.f32 %v675_v5, %v64_v2  ;;  %v348_v9 = vmax.f32 %v332_v7, 0.0 }
 0x108   :  { %v276_v10 = vpop.f32.mrf.mxu0  ;;  %v337_v23 = vld [vmem:[#allocation2 + $0x50] sm:$0xff] }
 0x109   :  { %322 = vst.msk [vmem:[#allocation2 + $0x70] sm:$0xff] %vm33_vm0, %v305_v8  ;;  %v303_v14 = vadd.f32 %v276_v10, %v62_v6  ;;  %692 = vmatmul.mubr.msk.f32.gmra.mxu1 %vm33_vm0, %v348_v9  ;;  %v353_v26 = vmax.f32 %v337_v23, 0.0 }
 0x10a   :  { %v676_v15 = vpop.f32.mrf.mxu0  ;;  %694 = vmatprep.mubr.msk.f32.mxu1 %vm33_vm0, %v349_v12  ;;  %v335_v17 = vld [vmem:[#allocation2 + $0x40] sm:$0xff] }
 0x10b   :  { %320 = vst.msk [vmem:[#allocation2 + $0x60] sm:$0xff] %vm33_vm0, %v303_v14  ;;  %v306_v18 = vadd.f32 %v676_v15, %v65_v11  ;;  %v351_v20 = vmax.f32 %v335_v17, 0.0 }
 0x10c   :  { %v279_v21 = vpop.f32.mrf.mxu0  ;;  %v338_v27 = vld [vmem:[#allocation2 + $0x58] sm:$0xff] }
 0x10d   :  { %323 = vst.msk [vmem:[#allocation2 + $0x78] sm:$0xff] %vm33_vm0, %v306_v18  ;;  %v304_v22 = vadd.f32 %v279_v21, %v63_v16  ;;  %695 = vmatmul.mubr.msk.f32.gmra.mxu1 %vm33_vm0, %v350_v19  ;;  %v354_v29 = vmax.f32 %v338_v27, 0.0 }
 0x10e   :  { %697 = vmatprep.mubr.msk.f32.mxu1 %vm33_vm0, %v351_v20  ;;  %v336_v24 = vld [vmem:[#allocation2 + $0x48] sm:$0xff] }
 0x10f   :  { %321 = vst.msk [vmem:[#allocation2 + $0x68] sm:$0xff] %vm33_vm0, %v304_v22  ;;  %v352_v25 = vmax.f32 %v336_v24, 0.0 }
 0x110   :  { %v341_v31 = vld [vmem:[#allocation2 + $0x70] sm:$0xff] }
 0x111   :  { %698 = vmatmul.mubr.msk.f32.gmra.mxu1 %vm33_vm0, %v352_v25  ;;  %v357_v34 = vmax.f32 %v341_v31, 0.0 }
 0x112   :  { %700 = vmatprep.mubr.msk.f32.mxu1 %vm33_vm0, %v353_v26  ;;  %v339_v28 = vld [vmem:[#allocation2 + $0x60] sm:$0xff] }
 0x113   :  { %v355_v30 = vmax.f32 %v339_v28, 0.0 }
 0x114   :  { %v342_v35 = vld [vmem:[#allocation2 + $0x78] sm:$0xff] }
 0x115   :  { %701 = vmatmul.mubr.msk.f32.gmra.mxu1 %vm33_vm0, %v354_v29  ;;  %v358_v36 = vmax.f32 %v342_v35, 0.0 }
 0x116   :  { %703 = vmatprep.mubr.msk.f32.mxu1 %vm33_vm0, %v355_v30  ;;  %v340_v32 = vld [vmem:[#allocation2 + $0x68] sm:$0xff] }
 0x117   :  { %v356_v33 = vmax.f32 %v340_v32, 0.0 }
 0x119   :  { %704 = vmatmul.mubr.msk.f32.gmra.mxu1 %vm33_vm0, %v356_v33 }
 0x11a   :  { %706 = vmatprep.mubr.msk.f32.mxu1 %vm33_vm0, %v357_v34 }
 0x11d   :  { %707 = vmatmul.mubr.msk.f32.gmra.mxu1 %vm33_vm0, %v358_v36 }
 0x1c1   :  { %v687_v37 = vpop.f32.mrf.mxu1 }
 0x1c2   :  { %557 = vst.msk [vmem:[%s941_s3 + $0x8] sm:$0xff] %vm33_vm0, %v687_v37 }
 0x1c3   :  { %v477_v38 = vpop.f32.mrf.mxu1 }
 0x1c4   :  { %556 = vst.msk [vmem:[%s941_s3] sm:$0xff] %vm33_vm0, %v477_v38 }
 0x1c5   :  { %v690_v39 = vpop.f32.mrf.mxu1 }
 0x1c6   :  { %559 = vst.msk [vmem:[%s941_s3 + $0x18] sm:$0xff] %vm33_vm0, %v690_v39 }
 0x1c7   :  { %v487_v40 = vpop.f32.mrf.mxu1 }
 0x1c8   :  { %558 = vst.msk [vmem:[%s941_s3 + $0x10] sm:$0xff] %vm33_vm0, %v487_v40 }
 0x1c9   :  { %v693_v41 = vpop.f32.mrf.mxu1 }
 0x1ca   :  { %561 = vst.msk [vmem:[%s941_s3 + $0x28] sm:$0xff] %vm33_vm0, %v693_v41 }
 0x1cb   :  { %v497_v42 = vpop.f32.mrf.mxu1 }
 0x1cc   :  { %560 = vst.msk [vmem:[%s941_s3 + $0x20] sm:$0xff] %vm33_vm0, %v497_v42 }
 0x1cd   :  { %v696_v43 = vpop.f32.mrf.mxu1 }
 0x1ce   :  { %563 = vst.msk [vmem:[%s941_s3 + $0x38] sm:$0xff] %vm33_vm0, %v696_v43 }
 0x1cf   :  { %v507_v44 = vpop.f32.mrf.mxu1 }
 0x1d0   :  { %562 = vst.msk [vmem:[%s941_s3 + $0x30] sm:$0xff] %vm33_vm0, %v507_v44 }
 0x1d1   :  { %v699_v45 = vpop.f32.mrf.mxu1 }
 0x1d2   :  { %565 = vst.msk [vmem:[%s941_s3 + $0x48] sm:$0xff] %vm33_vm0, %v699_v45 }
 0x1d3   :  { %v517_v46 = vpop.f32.mrf.mxu1 }
 0x1d4   :  { %564 = vst.msk [vmem:[%s941_s3 + $0x40] sm:$0xff] %vm33_vm0, %v517_v46 }
 0x1d5   :  { %v702_v47 = vpop.f32.mrf.mxu1 }
 0x1d6   :  { %567 = vst.msk [vmem:[%s941_s3 + $0x58] sm:$0xff] %vm33_vm0, %v702_v47 }
 0x1d7   :  { %v527_v48 = vpop.f32.mrf.mxu1 }
 0x1d8   :  { %566 = vst.msk [vmem:[%s941_s3 + $0x50] sm:$0xff] %vm33_vm0, %v527_v48 }
 0x1d9   :  { %v705_v49 = vpop.f32.mrf.mxu1 }
 0x1da   :  { %569 = vst.msk [vmem:[%s941_s3 + $0x68] sm:$0xff] %vm33_vm0, %v705_v49 }
 0x1db   :  { %v537_v50 = vpop.f32.mrf.mxu1 }
 0x1dc   :  { %568 = vst.msk [vmem:[%s941_s3 + $0x60] sm:$0xff] %vm33_vm0, %v537_v50 }
 0x1dd   :  { %v708_v51 = vpop.f32.mrf.mxu1 }
 0x1de   :  { %571 = vst.msk [vmem:[%s941_s3 + $0x78] sm:$0xff] %vm33_vm0, %v708_v51 }
 0x1df   :  { %v547_v52 = vpop.f32.mrf.mxu1 }
 0x1e0   :  { %570 = vst.msk [vmem:[%s941_s3 + $0x70] sm:$0xff] %vm33_vm0, %v547_v52 }
 0x1e1   :  { %576 = vsyncpa [#allocation4], 1 }

</bundles_post_ra>
